<compile_context>
chip_gen: v5e
topology: v5e:2x2
jax: 0.10.0
libtpu: 0.0.40
codegen_flags: <defaults>
</compile_context>

<pallas_src>
import functools

import jax
import jax.numpy as jnp
from jax.experimental import pallas as pl
from jax.experimental.pallas import tpu as pltpu


def _conv_block_kernel(x_ref, w1_ref, b1_ref, w2_ref, b2_ref, o_ref,
                       xpad1, xpad2, *, B, H, W, Cin, Cout):
    """Fused (conv3x3 + BN + ReLU) x2 for B batch images stacked into one slab.

    x_ref : (B, H, W*Cin)          lane-dense input slab (compute dtype)
    w1_ref: (3, W*Cin,  W*Cout)    banded layer-1 weights (BN scale + kx pad folded)
    b1_ref: (1, W*Cout)            layer-1 folded BN bias (f32, tiled over W)
    w2_ref: (3, W*Cout, W*Cout)    banded layer-2 weights
    b2_ref: (1, W*Cout)            layer-2 folded BN bias (f32)
    o_ref : (B, H, W*Cout)         output slab (f32)
    xpad1 : VMEM (B*(H+2), W*Cin)  H-padded, batch-stacked layer-1 input
    xpad2 : VMEM (B*(H+2), W*Cout) H-padded, batch-stacked layer-2 input
    """
    Hp = H + 2
    Mo = B * Hp - 2          # MXU M: covers every valid output row of every image

    # ---- layer 1: stack the batch into one H-padded slab --------------------
    # Interior stores are lane-aligned (kx padding lives in the weights); only
    # the two halo rows per image are zeroed (they are never overwritten).
    zrow1 = jnp.zeros((1, W * Cin), xpad1.dtype)
    for b in range(B):
        base = b * Hp
        xpad1[pl.ds(base, 1), :] = zrow1
        xpad1[pl.ds(base + H + 1, 1), :] = zrow1
        xpad1[pl.ds(base + 1, H), :] = x_ref[b]

    # One MXU matmul per kernel row (ky); the kx shift + Cin contraction live
    # inside the banded weight.  Accumulate in f32 (operands may be bf16).
    acc = jnp.zeros((Mo, W * Cout), dtype=jnp.float32)
    for dy in range(3):
        acc = acc + jnp.dot(xpad1[pl.ds(dy, Mo), :], w1_ref[dy],
                            preferred_element_type=jnp.float32)
    y1 = jnp.maximum(acc + b1_ref[...], 0.0)          # BN bias + ReLU, in f32

    # ---- layer 2: intermediate never leaves VMEM ----------------------------
    zrow2 = jnp.zeros((1, W * Cout), xpad2.dtype)
    for b in range(B):
        base = b * Hp
        xpad2[pl.ds(base, 1), :] = zrow2
        xpad2[pl.ds(base + H + 1, 1), :] = zrow2
        xpad2[pl.ds(base + 1, H), :] = y1[b * Hp:b * Hp + H].astype(xpad2.dtype)

    acc2 = jnp.zeros((Mo, W * Cout), dtype=jnp.float32)
    for dy in range(3):
        acc2 = acc2 + jnp.dot(xpad2[pl.ds(dy, Mo), :], w2_ref[dy],
                              preferred_element_type=jnp.float32)
    y2 = jnp.maximum(acc2 + b2_ref[...], 0.0)

    # Drop the 2 junk rows per image (they came from cross-image halo rows).
    for b in range(B):
        o_ref[b] = y2[b * Hp:b * Hp + H].astype(o_ref.dtype)


def _fold_bn(gamma, beta, running_mean, running_var, eps=1e-5):
    scale = gamma / jnp.sqrt(running_var + eps)
    bias = beta - running_mean * scale
    return scale.astype(jnp.float32), bias.astype(jnp.float32)


def _build_banded_weights(w, scale, W):
    """Banded ("block-Toeplitz") conv matrix with the kx padding folded in.

    w:     (Cout, Cin, 3, 3)  PyTorch OIHW conv weight
    scale: (Cout,)            folded BN scale (gamma / sqrt(var+eps))
    returns (3, W*Cin, W*Cout) with
        out[ky, x_in*Cin + ci, x_out*Cout + co] = w[co, ci, ky, kx] * scale[co]
        where x_in = x_out + kx - 1 and out-of-range taps are zero
        (exactly the padding=1 behaviour in the W direction).
    """
    Cout, Cin = int(w.shape[0]), int(w.shape[1])
    # (ky, kx, Cin, Cout), BN scale folded into the output channel.
    wf = (jnp.transpose(w, (2, 3, 1, 0)).astype(jnp.float32)
          * scale[None, None, None, :])
    x_in = jnp.arange(W)[None, :, None]                     # (1, W, 1)
    x_out = jnp.arange(W)[None, None, :]                    # (1, 1, W)
    dx = jnp.arange(3)[:, None, None]                       # (3, 1, 1)
    sel = (x_in == x_out + dx - 1).astype(jnp.float32)      # (3, W, W) Toeplitz
    # NOTE: output order 'ypioc' -> rows p*Cin+ci, cols o*Cout+co (the previous
    # 'ypico' ordering was the correctness bug).
    banded = jnp.einsum('dpo,ydic->ypioc', sel, wf)         # (3, W, Cin, W, Cout)
    return banded.reshape(3, W * Cin, W * Cout)


def prepare_conv_block_params(params, W, *, compute_dtype=jnp.float32):
    """Fold BN into the conv weights and build the banded matrices ONCE.

    Hoisted out of the per-call forward: the O(W^2*Cin*Cout) banded build and
    the BN fold run when parameters are loaded, not every forward call.
    Bias stays f32 (epilogue math is f32 even on the bf16 MXU path).
    """
    Cout = int(params["w1"].shape[0])
    s1, c1 = _fold_bn(params["g1"], params["b1"], params["m1"], params["v1"])
    s2, c2 = _fold_bn(params["g2"], params["b2"], params["m2"], params["v2"])
    return {
        "w1b": _build_banded_weights(params["w1"], s1, W).astype(compute_dtype),
        "b1": jnp.tile(c1, W).reshape(1, W * Cout),
        "w2b": _build_banded_weights(params["w2"], s2, W).astype(compute_dtype),
        "b2": jnp.tile(c2, W).reshape(1, W * Cout),
    }


def _default_batch_tile(N, H, max_m=256):
    """Largest divisor of N whose stacked M = tile*(H+2) still fits one MXU pass."""
    best = 1
    for d in range(1, N + 1):
        if N % d == 0 and d * (H + 2) <= max_m:
            best = d
    return best


def conv_block_forward_slab(x_slab, prep, *, W, batch_tile=None):
    """Lane-dense forward: (N, H, W*Cin) slab -> (N, H, W*Cout) slab.

    Use this entry point when chaining ConvBlocks so activations stay in the
    lane-dense NHWC slab layout (no per-block NCHW<->NHWC transposes).
    """
    N, H, WCin = x_slab.shape
    Cin = WCin // W
    WCout = prep["b1"].shape[-1]
    Cout = WCout // W
    compute_dtype = prep["w1b"].dtype

    B = batch_tile if batch_tile is not None else _default_batch_tile(N, H)
    assert N % B == 0, (N, B)

    kernel = functools.partial(_conv_block_kernel, B=B, H=H, W=W,
                               Cin=Cin, Cout=Cout)

    # TODO(synk): at scaled H/W/C add an H-tiled grid axis with a 2-row halo,
    # tile (or reformulate as a (9*Cin, Cout) matmul) the O(W^2*C^2) banded
    # weight, size tiles against v7x's 64 MiB VMEM via vmem_limit_bytes, and
    # single-buffer the grid-constant weight operands (pl.Buffered(1)).
    return pl.pallas_call(
        kernel,
        out_shape=jax.ShapeDtypeStruct((N, H, WCout), jnp.float32),
        grid_spec=pltpu.PrefetchScalarGridSpec(
            num_scalar_prefetch=0,
            grid=(N // B,),
            in_specs=[
                pl.BlockSpec((B, H, WCin), lambda n: (n, 0, 0)),
                pl.BlockSpec((3, WCin, WCout), lambda n: (0, 0, 0)),
                pl.BlockSpec((1, WCout), lambda n: (0, 0)),
                pl.BlockSpec((3, WCout, WCout), lambda n: (0, 0, 0)),
                pl.BlockSpec((1, WCout), lambda n: (0, 0)),
            ],
            out_specs=pl.BlockSpec((B, H, WCout), lambda n: (n, 0, 0)),
            scratch_shapes=[
                pltpu.VMEM((B * (H + 2), WCin), compute_dtype),
                pltpu.VMEM((B * (H + 2), WCout), compute_dtype),
            ],
        ),
        compiler_params=pltpu.CompilerParams(
            dimension_semantics=("parallel",)),   # batch groups split across TCs
    )(x_slab.astype(compute_dtype), prep["w1b"], prep["b1"],
      prep["w2b"], prep["b2"])


@functools.partial(jax.jit, static_argnames=("batch_tile",))
def conv_block_forward(x_nchw, prep, batch_tile=None):
    """ConvBlock.forward with PyTorch NCHW at the boundary (eval-mode BN)."""
    N, Cin, H, W = x_nchw.shape
    WCout = prep["b1"].shape[-1]
    Cout = WCout // W
    # NCHW -> NHWC -> lane-dense (N, H, W*Cin) slab (reshape is layout-free).
    x = jnp.transpose(x_nchw, (0, 2, 3, 1)).reshape(N, H, W * Cin)
    out = conv_block_forward_slab(x, prep, W=W, batch_tile=batch_tile)
    return jnp.transpose(out.reshape(N, H, W, Cout), (0, 3, 1, 2))


def init_conv_block_params(key, in_channels, out_channels):
    """Deterministic synthetic parameters matching ConvBlock.__init__ shapes."""
    ks = jax.random.split(key, 10)
    p = {}
    # conv1: Conv2d(in, out, 3, padding=1, bias=False)
    p["w1"] = 0.1 * jax.random.normal(ks[0], (out_channels, in_channels, 3, 3),
                                      jnp.float32)
    # bn1: BatchNorm2d(out)
    p["g1"] = 1.0 + 0.1 * jax.random.normal(ks[1], (out_channels,), jnp.float32)
    p["b1"] = 0.05 * jax.random.normal(ks[2], (out_channels,), jnp.float32)
    p["m1"] = 0.1 * jax.random.normal(ks[3], (out_channels,), jnp.float32)
    p["v1"] = 1.0 + 0.1 * jax.random.uniform(ks[4], (out_channels,), jnp.float32)
    # conv2: Conv2d(out, out, 3, padding=1, bias=False)
    p["w2"] = 0.1 * jax.random.normal(ks[5], (out_channels, out_channels, 3, 3),
                                      jnp.float32)
    # bn2: BatchNorm2d(out)
    p["g2"] = 1.0 + 0.1 * jax.random.normal(ks[6], (out_channels,), jnp.float32)
    p["b2"] = 0.05 * jax.random.normal(ks[7], (out_channels,), jnp.float32)
    p["m2"] = 0.1 * jax.random.normal(ks[8], (out_channels,), jnp.float32)
    p["v2"] = 1.0 + 0.1 * jax.random.uniform(ks[9], (out_channels,), jnp.float32)
    return p


if __name__ == "__main__":
    key = jax.random.PRNGKey(0)
    k_in, k_par = jax.random.split(key)

    N, Cin, H, W = 2, 4, 16, 16
    Cout = 8
    x = jax.random.normal(k_in, (N, Cin, H, W), jnp.float32)
    params = init_conv_block_params(k_par, Cin, Cout)

    # Reference: plain-JAX conv + eval-mode BN + ReLU.
    def ref_forward(x_nchw, p):
        def conv(xx, w):
            return jax.lax.conv_general_dilated(
                xx, w, window_strides=(1, 1), padding=((1, 1), (1, 1)),
                dimension_numbers=("NCHW", "OIHW", "NCHW"))

        def bn_relu(xx, g, b, m, v):
            s = g / jnp.sqrt(v + 1e-5)
            c = b - m * s
            return jnp.maximum(
                xx * s[None, :, None, None] + c[None, :, None, None], 0.0)

        y = bn_relu(conv(x_nchw, p["w1"]), p["g1"], p["b1"], p["m1"], p["v1"])
        y = bn_relu(conv(y, p["w2"]), p["g2"], p["b2"], p["m2"], p["v2"])
        return y

    ref = ref_forward(x, params)

    # f32 path: exactness check against the reference.
    prep32 = prepare_conv_block_params(params, W, compute_dtype=jnp.float32)
    out32 = jax.block_until_ready(conv_block_forward(x, prep32))
    assert out32.shape == (N, Cout, H, W)
    err32 = float(jnp.max(jnp.abs(out32 - ref)))
    assert jnp.allclose(out32, ref, atol=1e-4, rtol=1e-4), err32

    # bf16 MXU path (v5e/v6e/v7x fast path): bf16 operands, f32 accumulation.
    prep16 = prepare_conv_block_params(params, W, compute_dtype=jnp.bfloat16)
    out16 = jax.block_until_ready(conv_block_forward(x, prep16))
    err16 = float(jnp.max(jnp.abs(out16 - ref)))
    assert err16 < 1e-1, err16

    print("KERNEL_OK")
</pallas_src>

<mosaic_0001>
module attributes {stable_mosaic.version = 11 : i64} {
  func.func @_conv_block_kernel(%arg0: i32, %arg1: memref<2x16x64xf32, #tpu.memory_space<vmem>>, %arg2: memref<3x64x128xf32, #tpu.memory_space<vmem>>, %arg3: memref<1x128xf32, #tpu.memory_space<vmem>>, %arg4: memref<3x128x128xf32, #tpu.memory_space<vmem>>, %arg5: memref<1x128xf32, #tpu.memory_space<vmem>>, %arg6: memref<2x16x128xf32, #tpu.memory_space<vmem>>, %arg7: memref<36x64xf32, #tpu.memory_space<vmem>>, %arg8: memref<36x128xf32, #tpu.memory_space<vmem>>) attributes {dimension_semantics = [#tpu.dimension_semantics<parallel>], iteration_bounds = array<i64: 1>, scalar_prefetch = 0 : i64, scratch_operands = 2 : i64, tpu.core_type = #tpu.core_type<tc>, window_params = [{transform_indices = @transform_0, window_bounds = array<i64: 2, 16, 64>}, {pipeline_mode = #tpu.pipeline_mode<synchronous>, transform_indices = @transform_1, window_bounds = array<i64: 3, 64, 128>}, {pipeline_mode = #tpu.pipeline_mode<synchronous>, transform_indices = @transform_2, window_bounds = array<i64: 1, 128>}, {pipeline_mode = #tpu.pipeline_mode<synchronous>, transform_indices = @transform_3, window_bounds = array<i64: 3, 128, 128>}, {pipeline_mode = #tpu.pipeline_mode<synchronous>, transform_indices = @transform_4, window_bounds = array<i64: 1, 128>}, {transform_indices = @transform_5, window_bounds = array<i64: 2, 16, 128>}]} {
    %cst = arith.constant 0.000000e+00 : f32
    %0 = vector.broadcast %cst : f32 to vector<1x64xf32>
    %c0 = arith.constant 0 : index
    %c0_0 = arith.constant 0 : index
    %1 = vector.load %arg7[%c0, %c0_0] : memref<36x64xf32, #tpu.memory_space<vmem>>, vector<1x64xf32>
    tpu.vector_store %arg7[%c0, %c0_0], %0 {strides = array<i32>} : memref<36x64xf32, #tpu.memory_space<vmem>>, vector<1x64xf32>,
    %c17 = arith.constant 17 : index
    %c0_1 = arith.constant 0 : index
    %2 = vector.load %arg7[%c17, %c0_1] : memref<36x64xf32, #tpu.memory_space<vmem>>, vector<1x64xf32>
    tpu.vector_store %arg7[%c17, %c0_1], %0 {strides = array<i32>} : memref<36x64xf32, #tpu.memory_space<vmem>>, vector<1x64xf32>,
    %c0_2 = arith.constant 0 : index
    %c0_3 = arith.constant 0 : index
    %c0_4 = arith.constant 0 : index
    %3 = vector.load %arg1[%c0_2, %c0_3, %c0_4] : memref<2x16x64xf32, #tpu.memory_space<vmem>>, vector<1x16x64xf32>
    %4 = vector.shape_cast %3 : vector<1x16x64xf32> to vector<16x64xf32>
    %c1 = arith.constant 1 : index
    %c0_5 = arith.constant 0 : index
    %5 = vector.load %arg7[%c1, %c0_5] : memref<36x64xf32, #tpu.memory_space<vmem>>, vector<16x64xf32>
    tpu.vector_store %arg7[%c1, %c0_5], %4 {strides = array<i32>} : memref<36x64xf32, #tpu.memory_space<vmem>>, vector<16x64xf32>,
    %c18 = arith.constant 18 : index
    %c0_6 = arith.constant 0 : index
    %6 = vector.load %arg7[%c18, %c0_6] : memref<36x64xf32, #tpu.memory_space<vmem>>, vector<1x64xf32>
    tpu.vector_store %arg7[%c18, %c0_6], %0 {strides = array<i32>} : memref<36x64xf32, #tpu.memory_space<vmem>>, vector<1x64xf32>,
    %c35 = arith.constant 35 : index
    %c0_7 = arith.constant 0 : index
    %7 = vector.load %arg7[%c35, %c0_7] : memref<36x64xf32, #tpu.memory_space<vmem>>, vector<1x64xf32>
    tpu.vector_store %arg7[%c35, %c0_7], %0 {strides = array<i32>} : memref<36x64xf32, #tpu.memory_space<vmem>>, vector<1x64xf32>,
    %c1_8 = arith.constant 1 : index
    %c0_9 = arith.constant 0 : index
    %c0_10 = arith.constant 0 : index
    %8 = vector.load %arg1[%c1_8, %c0_9, %c0_10] : memref<2x16x64xf32, #tpu.memory_space<vmem>>, vector<1x16x64xf32>
    %9 = vector.shape_cast %8 : vector<1x16x64xf32> to vector<16x64xf32>
    %c19 = arith.constant 19 : index
    %c0_11 = arith.constant 0 : index
    %10 = vector.load %arg7[%c19, %c0_11] : memref<36x64xf32, #tpu.memory_space<vmem>>, vector<16x64xf32>
    tpu.vector_store %arg7[%c19, %c0_11], %9 {strides = array<i32>} : memref<36x64xf32, #tpu.memory_space<vmem>>, vector<16x64xf32>,
    %cst_12 = arith.constant 0.000000e+00 : f32
    %11 = vector.broadcast %cst_12 : f32 to vector<34x128xf32>
    %c0_13 = arith.constant 0 : index
    %c0_14 = arith.constant 0 : index
    %12 = vector.load %arg7[%c0_13, %c0_14] : memref<36x64xf32, #tpu.memory_space<vmem>>, vector<34x64xf32>
    %c0_15 = arith.constant 0 : index
    %c0_16 = arith.constant 0 : index
    %c0_17 = arith.constant 0 : index
    %13 = vector.load %arg2[%c0_15, %c0_16, %c0_17] : memref<3x64x128xf32, #tpu.memory_space<vmem>>, vector<1x64x128xf32>
    %14 = vector.shape_cast %13 : vector<1x64x128xf32> to vector<64x128xf32>
    %cst_18 = arith.constant dense<0.000000e+00> : vector<34x128xf32>
    %15 = tpu.matmul %12, %14, %cst_18 {dimension_numbers = #tpu.dot_dimension_numbers<[1], [0], [0], [1], [0, 0, 1, 1], [], []>} : vector<34x64xf32>, vector<64x128xf32>, vector<34x128xf32> -> vector<34x128xf32>
    %16 = arith.addf %11, %15 : vector<34x128xf32>
    %c1_19 = arith.constant 1 : index
    %c0_20 = arith.constant 0 : index
    %17 = vector.load %arg7[%c1_19, %c0_20] : memref<36x64xf32, #tpu.memory_space<vmem>>, vector<34x64xf32>
    %c1_21 = arith.constant 1 : index
    %c0_22 = arith.constant 0 : index
    %c0_23 = arith.constant 0 : index
    %18 = vector.load %arg2[%c1_21, %c0_22, %c0_23] : memref<3x64x128xf32, #tpu.memory_space<vmem>>, vector<1x64x128xf32>
    %19 = vector.shape_cast %18 : vector<1x64x128xf32> to vector<64x128xf32>
    %cst_24 = arith.constant dense<0.000000e+00> : vector<34x128xf32>
    %20 = tpu.matmul %17, %19, %cst_24 {dimension_numbers = #tpu.dot_dimension_numbers<[1], [0], [0], [1], [0, 0, 1, 1], [], []>} : vector<34x64xf32>, vector<64x128xf32>, vector<34x128xf32> -> vector<34x128xf32>
    %21 = arith.addf %16, %20 : vector<34x128xf32>
    %c2 = arith.constant 2 : index
    %c0_25 = arith.constant 0 : index
    %22 = vector.load %arg7[%c2, %c0_25] : memref<36x64xf32, #tpu.memory_space<vmem>>, vector<34x64xf32>
    %c2_26 = arith.constant 2 : index
    %c0_27 = arith.constant 0 : index
    %c0_28 = arith.constant 0 : index
    %23 = vector.load %arg2[%c2_26, %c0_27, %c0_28] : memref<3x64x128xf32, #tpu.memory_space<vmem>>, vector<1x64x128xf32>
    %24 = vector.shape_cast %23 : vector<1x64x128xf32> to vector<64x128xf32>
    %cst_29 = arith.constant dense<0.000000e+00> : vector<34x128xf32>
    %25 = tpu.matmul %22, %24, %cst_29 {dimension_numbers = #tpu.dot_dimension_numbers<[1], [0], [0], [1], [0, 0, 1, 1], [], []>} : vector<34x64xf32>, vector<64x128xf32>, vector<34x128xf32> -> vector<34x128xf32>
    %26 = arith.addf %21, %25 : vector<34x128xf32>
    %c0_30 = arith.constant 0 : index
    %c0_31 = arith.constant 0 : index
    %27 = vector.load %arg3[%c0_30, %c0_31] : memref<1x128xf32, #tpu.memory_space<vmem>>, vector<1x128xf32>
    %28 = vector.broadcast %27 : vector<1x128xf32> to vector<34x128xf32>
    %29 = arith.addf %26, %28 : vector<34x128xf32>
    %cst_32 = arith.constant 0.000000e+00 : f32
    %30 = vector.broadcast %cst_32 : f32 to vector<34x128xf32>
    %31 = arith.maximumf %29, %30 : vector<34x128xf32>
    %cst_33 = arith.constant 0.000000e+00 : f32
    %32 = vector.broadcast %cst_33 : f32 to vector<1x128xf32>
    %c0_34 = arith.constant 0 : index
    %c0_35 = arith.constant 0 : index
    %33 = vector.load %arg8[%c0_34, %c0_35] : memref<36x128xf32, #tpu.memory_space<vmem>>, vector<1x128xf32>
    tpu.vector_store %arg8[%c0_34, %c0_35], %32 {strides = array<i32>} : memref<36x128xf32, #tpu.memory_space<vmem>>, vector<1x128xf32>,
    %c17_36 = arith.constant 17 : index
    %c0_37 = arith.constant 0 : index
    %34 = vector.load %arg8[%c17_36, %c0_37] : memref<36x128xf32, #tpu.memory_space<vmem>>, vector<1x128xf32>
    tpu.vector_store %arg8[%c17_36, %c0_37], %32 {strides = array<i32>} : memref<36x128xf32, #tpu.memory_space<vmem>>, vector<1x128xf32>,
    %35 = vector.extract_strided_slice %31 {offsets = [0, 0], sizes = [16, 128], strides = [1, 1]} : vector<34x128xf32> to vector<16x128xf32>
    %c1_38 = arith.constant 1 : index
    %c0_39 = arith.constant 0 : index
    %36 = vector.load %arg8[%c1_38, %c0_39] : memref<36x128xf32, #tpu.memory_space<vmem>>, vector<16x128xf32>
    tpu.vector_store %arg8[%c1_38, %c0_39], %35 {strides = array<i32>} : memref<36x128xf32, #tpu.memory_space<vmem>>, vector<16x128xf32>,
    %c18_40 = arith.constant 18 : index
    %c0_41 = arith.constant 0 : index
    %37 = vector.load %arg8[%c18_40, %c0_41] : memref<36x128xf32, #tpu.memory_space<vmem>>, vector<1x128xf32>
    tpu.vector_store %arg8[%c18_40, %c0_41], %32 {strides = array<i32>} : memref<36x128xf32, #tpu.memory_space<vmem>>, vector<1x128xf32>,
    %c35_42 = arith.constant 35 : index
    %c0_43 = arith.constant 0 : index
    %38 = vector.load %arg8[%c35_42, %c0_43] : memref<36x128xf32, #tpu.memory_space<vmem>>, vector<1x128xf32>
    tpu.vector_store %arg8[%c35_42, %c0_43], %32 {strides = array<i32>} : memref<36x128xf32, #tpu.memory_space<vmem>>, vector<1x128xf32>,
    %39 = vector.extract_strided_slice %31 {offsets = [18, 0], sizes = [16, 128], strides = [1, 1]} : vector<34x128xf32> to vector<16x128xf32>
    %c19_44 = arith.constant 19 : index
    %c0_45 = arith.constant 0 : index
    %40 = vector.load %arg8[%c19_44, %c0_45] : memref<36x128xf32, #tpu.memory_space<vmem>>, vector<16x128xf32>
    tpu.vector_store %arg8[%c19_44, %c0_45], %39 {strides = array<i32>} : memref<36x128xf32, #tpu.memory_space<vmem>>, vector<16x128xf32>,
    %cst_46 = arith.constant 0.000000e+00 : f32
    %41 = vector.broadcast %cst_46 : f32 to vector<34x128xf32>
    %c0_47 = arith.constant 0 : index
    %c0_48 = arith.constant 0 : index
    %42 = vector.load %arg8[%c0_47, %c0_48] : memref<36x128xf32, #tpu.memory_space<vmem>>, vector<34x128xf32>
    %c0_49 = arith.constant 0 : index
    %c0_50 = arith.constant 0 : index
    %c0_51 = arith.constant 0 : index
    %43 = vector.load %arg4[%c0_49, %c0_50, %c0_51] : memref<3x128x128xf32, #tpu.memory_space<vmem>>, vector<1x128x128xf32>
    %44 = vector.shape_cast %43 : vector<1x128x128xf32> to vector<128x128xf32>
    %cst_52 = arith.constant dense<0.000000e+00> : vector<34x128xf32>
    %45 = tpu.matmul %42, %44, %cst_52 {dimension_numbers = #tpu.dot_dimension_numbers<[1], [0], [0], [1], [0, 0, 1, 1], [], []>} : vector<34x128xf32>, vector<128x128xf32>, vector<34x128xf32> -> vector<34x128xf32>
    %46 = arith.addf %41, %45 : vector<34x128xf32>
    %c1_53 = arith.constant 1 : index
    %c0_54 = arith.constant 0 : index
    %47 = vector.load %arg8[%c1_53, %c0_54] : memref<36x128xf32, #tpu.memory_space<vmem>>, vector<34x128xf32>
    %c1_55 = arith.constant 1 : index
    %c0_56 = arith.constant 0 : index
    %c0_57 = arith.constant 0 : index
    %48 = vector.load %arg4[%c1_55, %c0_56, %c0_57] : memref<3x128x128xf32, #tpu.memory_space<vmem>>, vector<1x128x128xf32>
    %49 = vector.shape_cast %48 : vector<1x128x128xf32> to vector<128x128xf32>
    %cst_58 = arith.constant dense<0.000000e+00> : vector<34x128xf32>
    %50 = tpu.matmul %47, %49, %cst_58 {dimension_numbers = #tpu.dot_dimension_numbers<[1], [0], [0], [1], [0, 0, 1, 1], [], []>} : vector<34x128xf32>, vector<128x128xf32>, vector<34x128xf32> -> vector<34x128xf32>
    %51 = arith.addf %46, %50 : vector<34x128xf32>
    %c2_59 = arith.constant 2 : index
    %c0_60 = arith.constant 0 : index
    %52 = vector.load %arg8[%c2_59, %c0_60] : memref<36x128xf32, #tpu.memory_space<vmem>>, vector<34x128xf32>
    %c2_61 = arith.constant 2 : index
    %c0_62 = arith.constant 0 : index
    %c0_63 = arith.constant 0 : index
    %53 = vector.load %arg4[%c2_61, %c0_62, %c0_63] : memref<3x128x128xf32, #tpu.memory_space<vmem>>, vector<1x128x128xf32>
    %54 = vector.shape_cast %53 : vector<1x128x128xf32> to vector<128x128xf32>
    %cst_64 = arith.constant dense<0.000000e+00> : vector<34x128xf32>
    %55 = tpu.matmul %52, %54, %cst_64 {dimension_numbers = #tpu.dot_dimension_numbers<[1], [0], [0], [1], [0, 0, 1, 1], [], []>} : vector<34x128xf32>, vector<128x128xf32>, vector<34x128xf32> -> vector<34x128xf32>
    %56 = arith.addf %51, %55 : vector<34x128xf32>
    %c0_65 = arith.constant 0 : index
    %c0_66 = arith.constant 0 : index
    %57 = vector.load %arg5[%c0_65, %c0_66] : memref<1x128xf32, #tpu.memory_space<vmem>>, vector<1x128xf32>
    %58 = vector.broadcast %57 : vector<1x128xf32> to vector<34x128xf32>
    %59 = arith.addf %56, %58 : vector<34x128xf32>
    %cst_67 = arith.constant 0.000000e+00 : f32
    %60 = vector.broadcast %cst_67 : f32 to vector<34x128xf32>
    %61 = arith.maximumf %59, %60 : vector<34x128xf32>
    %62 = vector.extract_strided_slice %61 {offsets = [0, 0], sizes = [16, 128], strides = [1, 1]} : vector<34x128xf32> to vector<16x128xf32>
    %c0_68 = arith.constant 0 : index
    %c0_69 = arith.constant 0 : index
    %c0_70 = arith.constant 0 : index
    %63 = vector.load %arg6[%c0_68, %c0_69, %c0_70] : memref<2x16x128xf32, #tpu.memory_space<vmem>>, vector<1x16x128xf32>
    %64 = vector.shape_cast %63 : vector<1x16x128xf32> to vector<16x128xf32>
    %65 = vector.shape_cast %62 : vector<16x128xf32> to vector<1x16x128xf32>
    tpu.vector_store %arg6[%c0_68, %c0_69, %c0_70], %65 {strides = array<i32>} : memref<2x16x128xf32, #tpu.memory_space<vmem>>, vector<1x16x128xf32>,
    %66 = vector.extract_strided_slice %61 {offsets = [18, 0], sizes = [16, 128], strides = [1, 1]} : vector<34x128xf32> to vector<16x128xf32>
    %c1_71 = arith.constant 1 : index
    %c0_72 = arith.constant 0 : index
    %c0_73 = arith.constant 0 : index
    %67 = vector.load %arg6[%c1_71, %c0_72, %c0_73] : memref<2x16x128xf32, #tpu.memory_space<vmem>>, vector<1x16x128xf32>
    %68 = vector.shape_cast %67 : vector<1x16x128xf32> to vector<16x128xf32>
    %69 = vector.shape_cast %66 : vector<16x128xf32> to vector<1x16x128xf32>
    tpu.vector_store %arg6[%c1_71, %c0_72, %c0_73], %69 {strides = array<i32>} : memref<2x16x128xf32, #tpu.memory_space<vmem>>, vector<1x16x128xf32>,
    return
  }
  func.func @transform_0(%arg0: i32) -> (i32, i32, i32) {
    %c0_i32 = arith.constant 0 : i32
    %c0_i32_0 = arith.constant 0 : i32
    %c0_i32_1 = arith.constant 0 : i32
    return %arg0, %c0_i32, %c0_i32_0 : i32, i32, i32
  }
  func.func @transform_1(%arg0: i32) -> (i32, i32, i32) {
    %c0_i32 = arith.constant 0 : i32
    %c0_i32_0 = arith.constant 0 : i32
    %c0_i32_1 = arith.constant 0 : i32
    %c0_i32_2 = arith.constant 0 : i32
    return %c0_i32, %c0_i32_0, %c0_i32_1 : i32, i32, i32
  }
  func.func @transform_2(%arg0: i32) -> (i32, i32) {
    %c0_i32 = arith.constant 0 : i32
    %c0_i32_0 = arith.constant 0 : i32
    %c0_i32_1 = arith.constant 0 : i32
    return %c0_i32, %c0_i32_0 : i32, i32
  }
  func.func @transform_3(%arg0: i32) -> (i32, i32, i32) {
    %c0_i32 = arith.constant 0 : i32
    %c0_i32_0 = arith.constant 0 : i32
    %c0_i32_1 = arith.constant 0 : i32
    %c0_i32_2 = arith.constant 0 : i32
    return %c0_i32, %c0_i32_0, %c0_i32_1 : i32, i32, i32
  }
  func.func @transform_4(%arg0: i32) -> (i32, i32) {
    %c0_i32 = arith.constant 0 : i32
    %c0_i32_0 = arith.constant 0 : i32
    %c0_i32_1 = arith.constant 0 : i32
    return %c0_i32, %c0_i32_0 : i32, i32
  }
  func.func @transform_5(%arg0: i32) -> (i32, i32, i32) {
    %c0_i32 = arith.constant 0 : i32
    %c0_i32_0 = arith.constant 0 : i32
    %c0_i32_1 = arith.constant 0 : i32
    return %arg0, %c0_i32, %c0_i32_0 : i32, i32, i32
  }
}

</mosaic_0001>

<bundles_post_ra>
// kernel: conv_block_forward.1
= control target key start
LH: loop header
LB: loop body
LE: loop exit
PB: predicated region body
PF: predicated region fallthrough
CT: control target
= control target key end

     0   :  { %10 = vsyncpa [#allocation5], 0  ;;  %s560_s21 = smov [#allocation4]   ;;  %s561_s23 = smov 128   ;;  %s793_s0 = inlined_call_operand.vmem [shape: f32[2,16,64], index: 0, kind: input, shape index: {}]   ;;  %s794_s1 = inlined_call_operand.hbm [shape: f32[3,64,128], index: 1, kind: input, shape index: {}]   ;;  %s795_s2 = inlined_call_operand.vmem [shape: f32[1,128], index: 2, kind: input, shape index: {}]   ;;  %s796_s3 = inlined_call_operand.vmem [shape: f32[3,128,128], index: 3, kind: input, shape index: {}]   ;;  %s797_s4 = inlined_call_operand.vmem [shape: f32[1,128], index: 4, kind: input, shape index: {}]   ;;  %s798_s5 = inlined_call_operand.vmem [shape: f32[2,16,128], index: 5, kind: output, shape index: {}]  }
   0x1   :  { %s17_s20 = sshll.u32 %s794_s1, 4  ;;  %s19_s22 = sshll.u32 %s560_s21, 4  ;;  %s18_s20 = int_to_ptr.hbm [resolvable:$true] %s17_s20  ;;  %s20_s22 = int_to_ptr.vmem [resolvable:$true] %s19_s22 }
   0x2   :  { %s562_s24 = smov 8  }
   0x3   :  { %25 = dma.hbm_to_vmem [thread:$0]  %s18_s20, 3072, %s20_s22, [#allocation5], %s561_s23, %s561_s23, %s562_s24  }
   0x4   :  { %558 = dma.done.wait [#allocation5], 3072  }
   0x5   :  { %559 = vsyncadd [#allocation5], 4294964224  ;;  %vm36_vm0 = vcmask 516096   ;;  %v563_v0 = vmov 0.0   ;;  %v77_v1 = vld [vmem:[#allocation4 + $0x78] sm:$0xff]  ;;  %v76_v3 = vld [vmem:[#allocation4 + $0x70] sm:$0xff] }
   0x6   :  { %38 = vst.msk [vmem:[#allocation2 + $0x11] sm:$0x1] %vm36_vm0, %v563_v0  ;;  %v63_v2 = vld [vmem:[#allocation4 + $0x38] sm:$0xff]  ;;  %101 = vmatpush.msra.mxu0 %v77_v1  ;;  %v62_v4 = vld [vmem:[#allocation4 + $0x30] sm:$0xff]  ;;  %v75_v5 = vld [vmem:[#allocation4 + $0x68] sm:$0xff]  ;;  %vm41_vm1 = vcmask 523264  }
   0x7   :  { %44 = vst.msk [vmem:[#allocation2 + $0x12] sm:$0x1] %vm36_vm0, %v563_v0  ;;  %504 = vmatpush.msra.mxu2 %v63_v2  ;;  %v61_v6 = vld [vmem:[#allocation4 + $0x28] sm:$0xff]  ;;  %148 = vmatpush.msra.mxu1 %v63_v2  ;;  %v74_v7 = vld [vmem:[#allocation4 + $0x60] sm:$0xff]  ;;  %v39_v9 = vld [vmem:[%s793_s0] sm:$0xff] }
   0x8   :  { %37 = vst.msk [vmem:[#allocation2] sm:$0x1] %vm36_vm0, %v563_v0  ;;  %102 = vmatpush.msra.mxu0 %v76_v3  ;;  %v60_v8 = vld [vmem:[#allocation4 + $0x20] sm:$0xff]  ;;  %v73_v10 = vld [vmem:[#allocation4 + $0x58] sm:$0xff]  ;;  %v453_v12 = vld [vmem:[%s793_s0 + $0x18] sm:$0xff] }
   0x9   :  { %45 = vst.msk [vmem:[#allocation2 + $0x23] sm:$0x1] %vm36_vm0, %v563_v0  ;;  %505 = vmatpush.msra.mxu2 %v62_v4  ;;  %149 = vmatpush.msra.mxu1 %v62_v4  ;;  %v59_v11 = vld [vmem:[#allocation4 + $0x18] sm:$0xff]  ;;  %v72_v14 = vld [vmem:[#allocation4 + $0x50] sm:$0xff]  ;;  %v452_v16 = vld [vmem:[%s793_s0 + $0x10] sm:$0xff] }
   0xa   :  { %252 = vst [vmem:[#allocation3] sm:$0x1] %v563_v0  ;;  %103 = vmatpush.msra.mxu0 %v75_v5  ;;  %v40_v13 = vld [vmem:[%s793_s0 + $0x8] sm:$0xff]  ;;  %v58_v15 = vld [vmem:[#allocation4 + $0x10] sm:$0xff]  ;;  %v71_v17 = vld [vmem:[#allocation4 + $0x48] sm:$0xff] }
   0xb   :  { %253 = vst [vmem:[#allocation3 + $0x11] sm:$0x1] %v563_v0  ;;  %506 = vmatpush.msra.mxu2 %v61_v6  ;;  %150 = vmatpush.msra.mxu1 %v61_v6  ;;  %v57_v18 = vld [vmem:[#allocation4 + $0x8] sm:$0xff]  ;;  %v70_v19 = vld [vmem:[#allocation4 + $0x40] sm:$0xff]  ;;  %v185_v22 = vld [vmem:[#allocation4 + $0xb8] sm:$0xff] }
   0xc   :  { %256 = vst [vmem:[#allocation3 + $0x12] sm:$0x1] %v563_v0  ;;  %104 = vmatpush.msra.mxu0 %v74_v7  ;;  %v56_v20 = vld [vmem:[#allocation4] sm:$0xff]  ;;  %v184_v23 = vld [vmem:[#allocation4 + $0xb0] sm:$0xff]  ;;  %v183_v26 = vld [vmem:[#allocation4 + $0xa8] sm:$0xff] }
   0xd   :  { %257 = vst [vmem:[#allocation3 + $0x23] sm:$0x1] %v563_v0  ;;  %507 = vmatpush.msra.mxu2 %v60_v8  ;;  %151 = vmatpush.msra.mxu1 %v60_v8  ;;  %v182_v27 = vld [vmem:[#allocation4 + $0xa0] sm:$0xff]  ;;  %v181_v29 = vld [vmem:[#allocation4 + $0x98] sm:$0xff]  ;;  %v180_v30 = vld [vmem:[#allocation4 + $0x90] sm:$0xff] }
   0xe   :  { %42 = vst.msk [vmem:[#allocation2 + $0x1] sm:$0xff] %vm41_vm1, %v39_v9  ;;  %105 = vmatpush.msra.mxu0 %v73_v10  ;;  %v179_v32 = vld [vmem:[#allocation4 + $0x88] sm:$0xff]  ;;  %v178_v33 = vld [vmem:[#allocation4 + $0x80] sm:$0xff]  ;;  %v482_v48 = vld [vmem:[%s796_s3 + $0xe8] sm:$0xff] }
   0xf   :  { %50 = vst.msk [vmem:[#allocation2 + $0x1b] sm:$0xff] %vm41_vm1, %v453_v12  ;;  %508 = vmatpush.msra.mxu2 %v59_v11  ;;  %152 = vmatpush.msra.mxu1 %v59_v11  ;;  %v484_v44 = vld [vmem:[%s796_s3 + $0xf8] sm:$0xff]  ;;  %v483_v45 = vld [vmem:[%s796_s3 + $0xf0] sm:$0xff]  ;;  %v481_v49 = vld [vmem:[%s796_s3 + $0xe0] sm:$0xff] }
  0x10   :  { %43 = vst.msk [vmem:[#allocation2 + $0x9] sm:$0xff] %vm41_vm1, %v40_v13  ;;  %106 = vmatpush.msra.mxu0 %v72_v14  ;;  %304 = vmatpush.msra.mxu3 %v484_v44  ;;  %v281_v46 = vld [vmem:[%s796_s3 + $0x78] sm:$0xff]  ;;  %v280_v47 = vld [vmem:[%s796_s3 + $0x70] sm:$0xff]  ;;  %v279_v52 = vld [vmem:[%s796_s3 + $0x68] sm:$0xff] }
  0x11   :  { %49 = vst.msk [vmem:[#allocation2 + $0x13] sm:$0xff] %vm41_vm1, %v452_v16  ;;  %509 = vmatpush.msra.mxu2 %v58_v15  ;;  %153 = vmatpush.msra.mxu1 %v58_v15  ;;  %v480_v50 = vld [vmem:[%s796_s3 + $0xd8] sm:$0xff]  ;;  %v479_v51 = vld [vmem:[%s796_s3 + $0xd0] sm:$0xff]  ;;  %v278_v53 = vld [vmem:[%s796_s3 + $0x60] sm:$0xff] }
  0x12   :  { %107 = vmatpush.msra.mxu0 %v71_v17  ;;  %305 = vmatpush.msra.mxu3 %v483_v45  ;;  %v500_v54 = vld [vmem:[%s796_s3 + $0x178] sm:$0xff]  ;;  %v499_v55 = vld [vmem:[%s796_s3 + $0x170] sm:$0xff]  ;;  %v478_v57 = vld [vmem:[%s796_s3 + $0xc8] sm:$0xff] }
  0x13   :  { %510 = vmatpush.msra.mxu2 %v57_v18  ;;  %154 = vmatpush.msra.mxu1 %v57_v18  ;;  %v277_v56 = vld [vmem:[%s796_s3 + $0x58] sm:$0xff]  ;;  %v477_v58 = vld [vmem:[%s796_s3 + $0xc0] sm:$0xff]  ;;  %v276_v59 = vld [vmem:[%s796_s3 + $0x50] sm:$0xff] }
  0x14   :  { %108 = vmatpush.msra.mxu0 %v70_v19  ;;  %306 = vmatpush.msra.mxu3 %v482_v48  ;;  %v476_v60 = vld [vmem:[%s796_s3 + $0xb8] sm:$0xff]  ;;  %v475_v61 = vld [vmem:[%s796_s3 + $0xb0] sm:$0xff]  ;;  %v498_v62 = vld [vmem:[%s796_s3 + $0x168] sm:$0xff] }
  0x15   :  { %v64_v21 = vld [vmem:[#allocation2 + $0x1] sm:$0xff]  ;;  %511 = vmatpush.msra.mxu2 %v56_v20  ;;  %155 = vmatpush.msra.mxu1 %v56_v20  ;;  %v496_v3 = vld [vmem:[%s796_s3 + $0x158] sm:$0xff]  ;;  %v495_v7 = vld [vmem:[%s796_s3 + $0x150] sm:$0xff] }
  0x16   :  { %v55_v24 = vld [vmem:[#allocation2 + $0x20] sm:$0x3]  ;;  %454 = vmatmul.msk.f32.vlgmr.msra.gmra.mxu0 %vm41_vm1, %v64_v21  ;;  %v176_v43 = vld [vmem:[#allocation2 + $0x22] sm:$0x3]  ;;  %307 = vmatpush.msra.mxu3 %v481_v49  ;;  %v275_v63 = vld [vmem:[%s796_s3 + $0x48] sm:$0xff] }
  0x17   :  { %v51_v25 = vld [vmem:[#allocation2] sm:$0xff]  ;;  %209 = vmatpush.msrb.mxu2 %v185_v22  ;;  %v65_v28 = vld [vmem:[#allocation2 + $0x9] sm:$0xff]  ;;  %336 = vmatpush.msrb.mxu0 %v281_v46  ;;  %v273_v5 = vld [vmem:[%s796_s3 + $0x38] sm:$0xff] }
  0x18   :  { %463 = vmatmul.msk.f32.vlgmr.msra.gmra.mxu2 %vm41_vm1, %v55_v24  ;;  %459 = vmatmul.msk.f32.vlgmr.msra.gmra.mxu1 %vm41_vm1, %v51_v25  ;;  %v52_v31 = vld [vmem:[#allocation2 + $0x8] sm:$0xff]  ;;  %v66_v35 = vld [vmem:[#allocation2 + $0x11] sm:$0xff]  ;;  %v67_v38 = vld [vmem:[#allocation2 + $0x19] sm:$0xff] }
  0x19   :  { %210 = vmatpush.msrb.mxu2 %v184_v23  ;;  %v172_v34 = vld [vmem:[#allocation2 + $0x2] sm:$0xff]  ;;  %v53_v36 = vld [vmem:[#allocation2 + $0x10] sm:$0xff]  ;;  %v54_v39 = vld [vmem:[#allocation2 + $0x18] sm:$0xff]  ;;  %337 = vmatpush.msrb.mxu0 %v280_v47 }
  0x1a   :  { %v173_v37 = vld [vmem:[#allocation2 + $0xa] sm:$0xff]  ;;  %v174_v40 = vld [vmem:[#allocation2 + $0x12] sm:$0xff]  ;;  %v68_v41 = vld [vmem:[#allocation2 + $0x21] sm:$0x3]  ;;  %308 = vmatpush.msra.mxu3 %v480_v50  ;;  %390 = vmatpush.msrb.mxu1 %v500_v54 }
  0x1b   :  { %211 = vmatpush.msrb.mxu2 %v183_v26  ;;  %v175_v42 = vld [vmem:[#allocation2 + $0x1a] sm:$0xff]  ;;  %338 = vmatpush.msrb.mxu0 %v279_v52  ;;  %v474_v2 = vld [vmem:[%s796_s3 + $0xa8] sm:$0xff]  ;;  %v272_v8 = vld [vmem:[%s796_s3 + $0x30] sm:$0xff] }
  0x1c   :  { %309 = vmatpush.msra.mxu3 %v479_v51  ;;  %391 = vmatpush.msrb.mxu1 %v499_v55  ;;  %v497_v0 = vld [vmem:[%s796_s3 + $0x160] sm:$0xff]  ;;  %v472_v6 = vld [vmem:[%s796_s3 + $0x98] sm:$0xff]  ;;  %v471_v9 = vld [vmem:[%s796_s3 + $0x90] sm:$0xff] }
  0x1d   :  { %212 = vmatpush.msrb.mxu2 %v182_v27  ;;  %339 = vmatpush.msrb.mxu0 %v278_v53  ;;  %v274_v1 = vld [vmem:[%s796_s3 + $0x40] sm:$0xff]  ;;  %v494_v10 = vld [vmem:[%s796_s3 + $0x148] sm:$0xff]  ;;  %v492_v16 = vld [vmem:[%s796_s3 + $0x138] sm:$0xff] }
  0x1e   :  { %455 = vmatmul.msk.f32.gmra.mxu0 %vm41_vm1, %v65_v28  ;;  %310 = vmatpush.msra.mxu3 %v478_v57  ;;  %v473_v4 = vld [vmem:[%s796_s3 + $0xa0] sm:$0xff]  ;;  %v271_v11 = vld [vmem:[%s796_s3 + $0x28] sm:$0xff]  ;;  %v269_v17 = vld [vmem:[%s796_s3 + $0x18] sm:$0xff] }
  0x1f   :  { %213 = vmatpush.msrb.mxu2 %v181_v29  ;;  %340 = vmatpush.msrb.mxu0 %v277_v56  ;;  %v470_v12 = vld [vmem:[%s796_s3 + $0x88] sm:$0xff]  ;;  %v493_v13 = vld [vmem:[%s796_s3 + $0x140] sm:$0xff]  ;;  %v491_v18 = vld [vmem:[%s796_s3 + $0x130] sm:$0xff] }
  0x20   :  { %460 = vmatmul.msk.f32.gmra.mxu1 %vm41_vm1, %v52_v31  ;;  %311 = vmatpush.msra.mxu3 %v477_v58  ;;  %v270_v14 = vld [vmem:[%s796_s3 + $0x20] sm:$0xff]  ;;  %v268_v19 = vld [vmem:[%s796_s3 + $0x10] sm:$0xff]  ;;  %v490_v20 = vld [vmem:[%s796_s3 + $0x128] sm:$0xff] }
  0x21   :  { %214 = vmatpush.msrb.mxu2 %v180_v30  ;;  %341 = vmatpush.msrb.mxu0 %v276_v59  ;;  %v469_v15 = vld [vmem:[%s796_s3 + $0x80] sm:$0xff]  ;;  %v267_v21 = vld [vmem:[%s796_s3 + $0x8] sm:$0xff]  ;;  %v488_v24 = vld [vmem:[%s796_s3 + $0x118] sm:$0xff] }
  0x22   :  { %312 = vmatpush.msra.mxu3 %v476_v60  ;;  %392 = vmatpush.msrb.mxu1 %v498_v62  ;;  %v489_v22 = vld [vmem:[%s796_s3 + $0x120] sm:$0xff]  ;;  %v487_v25 = vld [vmem:[%s796_s3 + $0x110] sm:$0xff]  ;;  %v486_v27 = vld [vmem:[%s796_s3 + $0x108] sm:$0xff] }
  0x23   :  { %215 = vmatpush.msrb.mxu2 %v179_v32  ;;  %342 = vmatpush.msrb.mxu0 %v275_v63  ;;  %v266_v23 = vld [vmem:[%s796_s3] sm:$0xff] }
  0x24   :  { %313 = vmatpush.msra.mxu3 %v475_v61  ;;  %393 = vmatpush.msrb.mxu1 %v497_v0  ;;  %v485_v29 = vld [vmem:[%s796_s3 + $0x100] sm:$0xff] }
  0x25   :  { %216 = vmatpush.msrb.mxu2 %v178_v33  ;;  %343 = vmatpush.msrb.mxu0 %v274_v1 }
  0x26   :  { %464 = vmatmul.msk.f32.vlgmr.msrb.gmra.mxu2 %vm41_vm1, %v172_v34  ;;  %456 = vmatmul.msk.f32.gmra.mxu0 %vm41_vm1, %v66_v35  ;;  %v532_v34 = vld [vmem:[%s795_s2] ss:$0 sm:$0xff] }
  0x27   :  { %512 = vmatpush.msra.mxu2 %v281_v46  ;;  %314 = vmatpush.msra.mxu3 %v474_v2 }
  0x28   :  { %461 = vmatmul.msk.f32.gmra.mxu1 %vm41_vm1, %v53_v36  ;;  %344 = vmatpush.msrb.mxu0 %v273_v5 }
  0x29   :  { %513 = vmatpush.msra.mxu2 %v280_v47  ;;  %394 = vmatpush.msrb.mxu1 %v496_v3 }
  0x2a   :  { %315 = vmatpush.msra.mxu3 %v473_v4  ;;  %345 = vmatpush.msrb.mxu0 %v272_v8 }
  0x2b   :  { %514 = vmatpush.msra.mxu2 %v279_v52  ;;  %395 = vmatpush.msrb.mxu1 %v495_v7 }
  0x2c   :  { %316 = vmatpush.msra.mxu3 %v472_v6  ;;  %346 = vmatpush.msrb.mxu0 %v271_v11 }
  0x2d   :  { %515 = vmatpush.msra.mxu2 %v278_v53  ;;  %396 = vmatpush.msrb.mxu1 %v494_v10 }
  0x2e   :  { %465 = vmatmul.msk.f32.gmra.mxu2 %vm41_vm1, %v173_v37  ;;  %457 = vmatmul.msk.f32.gmra.mxu0 %vm41_vm1, %v67_v38 }
  0x2f   :  { %516 = vmatpush.msra.mxu2 %v277_v56  ;;  %317 = vmatpush.msra.mxu3 %v471_v9 }
  0x30   :  { %462 = vmatmul.msk.f32.gmra.mxu1 %vm41_vm1, %v54_v39  ;;  %347 = vmatpush.msrb.mxu0 %v270_v14 }
  0x31   :  { %517 = vmatpush.msra.mxu2 %v276_v59  ;;  %397 = vmatpush.msrb.mxu1 %v493_v13 }
  0x32   :  { %318 = vmatpush.msra.mxu3 %v470_v12  ;;  %348 = vmatpush.msrb.mxu0 %v269_v17 }
  0x33   :  { %518 = vmatpush.msra.mxu2 %v275_v63  ;;  %398 = vmatpush.msrb.mxu1 %v492_v16 }
  0x34   :  { %319 = vmatpush.msra.mxu3 %v469_v15  ;;  %349 = vmatpush.msrb.mxu0 %v268_v19  ;;  %v533_v15 = vld [vmem:[%s797_s4] ss:$0 sm:$0xff] }
  0x35   :  { %519 = vmatpush.msra.mxu2 %v274_v1  ;;  %399 = vmatpush.msrb.mxu1 %v491_v18 }
  0x36   :  { %466 = vmatmul.msk.f32.gmra.mxu2 %vm41_vm1, %v174_v40  ;;  %458 = vmatmul.msk.f32.gmra.mxu0 %vm41_vm1, %v68_v41 }
  0x37   :  { %520 = vmatpush.msra.mxu2 %v273_v5  ;;  %400 = vmatpush.msrb.mxu1 %v490_v20 }
  0x38   :  { %350 = vmatpush.msrb.mxu0 %v267_v21 }
  0x39   :  { %521 = vmatpush.msra.mxu2 %v272_v8  ;;  %401 = vmatpush.msrb.mxu1 %v489_v22 }
  0x3a   :  { %351 = vmatpush.msrb.mxu0 %v266_v23 }
  0x3b   :  { %522 = vmatpush.msra.mxu2 %v271_v11  ;;  %402 = vmatpush.msrb.mxu1 %v488_v24 }
  0x3d   :  { %523 = vmatpush.msra.mxu2 %v270_v14  ;;  %403 = vmatpush.msrb.mxu1 %v487_v25 }
  0x3e   :  { %467 = vmatmul.msk.f32.gmra.mxu2 %vm41_vm1, %v175_v42 }
  0x3f   :  { %524 = vmatpush.msra.mxu2 %v269_v17  ;;  %404 = vmatpush.msrb.mxu1 %v486_v27 }
  0x41   :  { %525 = vmatpush.msra.mxu2 %v268_v19  ;;  %405 = vmatpush.msrb.mxu1 %v485_v29 }
  0x43   :  { %526 = vmatpush.msra.mxu2 %v267_v21 }
  0x45   :  { %527 = vmatpush.msra.mxu2 %v266_v23 }
  0x46   :  { %468 = vmatmul.msk.f32.gmra.mxu2 %vm41_vm1, %v176_v43 }
  0x93   :  { %v110_v26 = vpop.f32.mrf.mxu0 }
  0x95   :  { %v157_v28 = vpop.f32.mrf.mxu1 }
  0x96   :  { %v158_v32 = vadd.f32 %v157_v28, %v110_v26 }
  0x9b   :  { %v169_v30 = vpop.f32.mrf.mxu2  ;;  %v113_v31 = vpop.f32.mrf.mxu0 }
  0x9d   :  { %v160_v33 = vpop.f32.mrf.mxu1 }
  0x9e   :  { %v161_v39 = vadd.f32 %v160_v33, %v113_v31 }
  0xa3   :  { %v116_v40 = vpop.f32.mrf.mxu0 }
  0xa5   :  { %v163_v42 = vpop.f32.mrf.mxu1 }
  0xa6   :  { %v164_v46 = vadd.f32 %v163_v42, %v116_v40 }
  0xa9   :  { %v218_v35 = vpop.f32.mrf.mxu2 }
  0xaa   :  { %v233_v36 = vadd.f32 %v218_v35, %v158_v32 }
  0xab   :  { %v119_v50 = vpop.f32.mrf.mxu0 }
  0xac   :  { %v242_v37 = vadd.f32 %v532_v34, %v233_v36 }
  0xad   :  { %v166_v51 = vpop.f32.mrf.mxu1 }
  0xae   :  { %v247_v38 = vmax.f32 %v242_v37, 0.0  ;;  %v167_v54 = vadd.f32 %v166_v51, %v119_v50 }
  0xb0   :  { %254 = vst [vmem:[#allocation3 + $0x1] sm:$0xff] %v247_v38  ;;  %320 = vmatmul.f32.vlgmr.msra.gmra.mxu3 %v247_v38 }
  0xb1   :  { %v221_v41 = vpop.f32.mrf.mxu2 }
  0xb2   :  { %v234_v43 = vadd.f32 %v221_v41, %v161_v39 }
  0xb3   :  { %v122_v60 = vpop.f32.mrf.mxu0 }
  0xb4   :  { %v243_v44 = vadd.f32 %v532_v34, %v234_v43  ;;  %v170_v0 = vadd.f32 %v169_v30, %v122_v60 }
  0xb6   :  { %v248_v45 = vmax.f32 %v243_v44, 0.0 }
  0xb7   :  { %v261_v47 = vld [vmem:[#allocation3] sm:$0xff] }
  0xb8   :  { %255 = vst [vmem:[#allocation3 + $0x9] sm:$0xff] %v248_v45  ;;  %352 = vmatmul.f32.vlgmr.msrb.gmra.mxu0 %v261_v47  ;;  %323 = vmatmul.f32.gmra.mxu3 %v248_v45 }
  0xb9   :  { %v224_v48 = vpop.f32.mrf.mxu2 }
  0xba   :  { %v235_v49 = vadd.f32 %v224_v48, %v164_v46 }
  0xbc   :  { %v244_v52 = vadd.f32 %v532_v34, %v235_v49 }
  0xbe   :  { %v249_v53 = vmax.f32 %v244_v52, 0.0 }
  0xbf   :  { %v262_v55 = vld [vmem:[#allocation3 + $0x8] sm:$0xff] }
  0xc0   :  { %v368_v56 = vld [vmem:[#allocation3 + $0x2] sm:$0xff]  ;;  %258 = vst [vmem:[#allocation3 + $0x11] sm:$0xfc] %v249_v53  ;;  %355 = vmatmul.f32.gmra.mxu0 %v262_v55  ;;  %v369_v1 = vld [vmem:[#allocation3 + $0xa] sm:$0xff] }
  0xc1   :  { %406 = vmatmul.f32.vlgmr.msrb.gmra.mxu1 %v368_v56  ;;  %v227_v57 = vpop.f32.mrf.mxu2 }
  0xc2   :  { %v236_v58 = vadd.f32 %v227_v57, %v167_v54 }
  0xc4   :  { %v245_v59 = vadd.f32 %v532_v34, %v236_v58 }
  0xc6   :  { %v250_v61 = vmax.f32 %v245_v59, 0.0 }
  0xc7   :  { %v284_v62 = vld [vmem:[#allocation3 + $0x11] sm:$0xff] }
  0xc8   :  { %v263_v63 = vld [vmem:[#allocation3 + $0x10] sm:$0xff]  ;;  %259 = vst [vmem:[#allocation3 + $0x19] sm:$0xff] %v250_v61  ;;  %326 = vmatmul.f32.gmra.mxu3 %v284_v62 }
  0xc9   :  { %358 = vmatmul.f32.gmra.mxu0 %v263_v63  ;;  %409 = vmatmul.f32.gmra.mxu1 %v369_v1  ;;  %v230_v2 = vpop.f32.mrf.mxu2 }
  0xca   :  { %v237_v3 = vadd.f32 %v230_v2, %v170_v0 }
  0xcc   :  { %v246_v4 = vadd.f32 %v532_v34, %v237_v3 }
  0xce   :  { %v251_v5 = vmax.f32 %v246_v4, 0.0 }
  0xcf   :  { %v264_v6 = vld [vmem:[#allocation3 + $0x18] sm:$0xff] }
  0xd0   :  { %v370_v7 = vld [vmem:[#allocation3 + $0x12] sm:$0xff]  ;;  %260 = vst [vmem:[#allocation3 + $0x21] sm:$0x3] %v251_v5  ;;  %329 = vmatmul.f32.gmra.mxu3 %v250_v61  ;;  %361 = vmatmul.f32.vlgmr.msra.gmra.mxu2 %v264_v6 }
  0xd1   :  { %412 = vmatmul.f32.gmra.mxu1 %v370_v7 }
  0xd7   :  { %v286_v8 = vld [vmem:[#allocation3 + $0x21] sm:$0x3] }
  0xd8   :  { %v265_v9 = vld [vmem:[#allocation3 + $0x20] sm:$0x3]  ;;  %332 = vmatmul.f32.gmra.mxu3 %v286_v8  ;;  %v372_v11 = vld [vmem:[#allocation3 + $0x22] sm:$0x3] }
  0xd9   :  { %v371_v10 = vld [vmem:[#allocation3 + $0x1a] sm:$0xff]  ;;  %364 = vmatmul.f32.gmra.mxu2 %v265_v9 }
  0xda   :  { %415 = vmatmul.f32.gmra.mxu1 %v371_v10 }
  0xe2   :  { %418 = vmatmul.f32.gmra.mxu1 %v372_v11 }
 0x133   :  { %v321_v13 = vpop.f32.mrf.mxu3 }
 0x135   :  { %v353_v12 = vpop.f32.mrf.mxu0 }
 0x136   :  { %v354_v14 = vadd.f32 %v353_v12, %v321_v13 }
 0x13b   :  { %v324_v21 = vpop.f32.mrf.mxu3 }
 0x13d   :  { %v356_v19 = vpop.f32.mrf.mxu0 }
 0x13e   :  { %v407_v16 = vpop.f32.mrf.mxu1  ;;  %v357_v22 = vadd.f32 %v356_v19, %v324_v21 }
 0x13f   :  { %v422_v17 = vadd.f32 %v407_v16, %v354_v14 }
 0x141   :  { %v431_v18 = vadd.f32 %v533_v15, %v422_v17 }
 0x143   :  { %v436_v20 = vmax.f32 %v431_v18, 0.0 }
 0x145   :  { %441 = vst [vmem:[%s798_s5] sm:$0xff] %v436_v20 }
 0x146   :  { %v410_v23 = vpop.f32.mrf.mxu1  ;;  %v359_v26 = vpop.f32.mrf.mxu0 }
 0x147   :  { %v423_v24 = vadd.f32 %v410_v23, %v357_v22 }
 0x149   :  { %v432_v25 = vadd.f32 %v533_v15, %v423_v24 }
 0x14b   :  { %v437_v27 = vmax.f32 %v432_v25, 0.0  ;;  %v327_v28 = vpop.f32.mrf.mxu3 }
 0x14c   :  { %v360_v29 = vadd.f32 %v359_v26, %v327_v28 }
 0x14d   :  { %442 = vst [vmem:[%s798_s5 + $0x8] sm:$0xff] %v437_v27 }
 0x14e   :  { %v413_v30 = vpop.f32.mrf.mxu1 }
 0x14f   :  { %v424_v31 = vadd.f32 %v413_v30, %v360_v29 }
 0x151   :  { %v433_v32 = vadd.f32 %v533_v15, %v424_v31 }
 0x153   :  { %v438_v33 = vmax.f32 %v433_v32, 0.0  ;;  %v330_v34 = vpop.f32.mrf.mxu3  ;;  %v362_v35 = vpop.f32.mrf.mxu2 }
 0x154   :  { %v363_v36 = vadd.f32 %v362_v35, %v330_v34 }
 0x155   :  { %501 = vst [vmem:[%s798_s5 + $0xe] sm:$0xfc] %v438_v33 }
 0x157   :  { %v416_v37 = vpop.f32.mrf.mxu1 }
 0x158   :  { %v425_v38 = vadd.f32 %v416_v37, %v363_v36 }
 0x15a   :  { %v434_v39 = vadd.f32 %v533_v15, %v425_v38 }
 0x15b   :  { %v333_v41 = vpop.f32.mrf.mxu3 }
 0x15c   :  { %v439_v40 = vmax.f32 %v434_v39, 0.0  ;;  %v365_v42 = vpop.f32.mrf.mxu2 }
 0x15d   :  { %v366_v43 = vadd.f32 %v365_v42, %v333_v41 }
 0x15e   :  { %502 = vst [vmem:[%s798_s5 + $0x16] sm:$0xff] %v439_v40 }
 0x15f   :  { %v419_v44 = vpop.f32.mrf.mxu1 }
 0x160   :  { %v426_v45 = vadd.f32 %v419_v44, %v366_v43 }
 0x162   :  { %v435_v46 = vadd.f32 %v533_v15, %v426_v45 }
 0x164   :  { %v440_v47 = vmax.f32 %v435_v46, 0.0 }
 0x166   :  { %503 = vst [vmem:[%s798_s5 + $0x1e] sm:$0x3] %v440_v47 }
 0x167   :  { %451 = vsyncpa [#allocation5], 1 }

</bundles_post_ra>
